<compile_context>
chip_gen: v7x
topology: tpu7x:2x2x1
jax: 0.10.0
libtpu: 0.0.40
codegen_flags: <defaults>
</compile_context>

<pallas_src>
import jax
import jax.numpy as jnp
from jax.experimental import pallas as pl
from jax.experimental.pallas import tpu as pltpu


def _im2seq_kernel(x_ref, o_ref):
    # x_ref block: (TB, C_blk, W_blk)  ->  o_ref block: (TB, W_blk, C_blk)
    o_ref[...] = jnp.transpose(x_ref[...], (0, 2, 1))


def im2seq(x, *, tile=512):
    """x: (B, C, H, W) with H == 1  ->  (B, W, C)"""
    B, C, H, W = x.shape
    assert H == 1, "Im2Seq requires H == 1"
    x3 = x.reshape(B, C, W)  # squeeze(dim=2): pure layout glue

    itemsize = jnp.dtype(x.dtype).itemsize
    plane_bytes = C * W * itemsize
    tile_plane_cap = tile * tile * itemsize  # 1 MiB for f32 @ tile=512

    if plane_bytes <= tile_plane_cap:
        # ---- Path A: batched full-plane blocks (skinny real-OCR shapes) ----
        target_step_bytes = 2 << 20   # aim for >= ~2 MiB moved per grid step
        max_step_bytes = 4 << 20      # keep double-buffered footprint bounded
        tb = max(1, (target_step_bytes + plane_bytes - 1) // plane_bytes)
        tb = min(tb, max(1, max_step_bytes // plane_bytes))
        tb = int(min(tb, B))
        n_b = pl.cdiv(B, tb)
        step_bytes = tb * plane_bytes
        block_bytes = 2 * step_bytes  # one input block + one output block

        # Near-zero compute per block: if we're stuck with many small steps,
        # a 3rd buffer hides the exposed DMA latency between them.
        use_triple = (n_b > 1) and (step_bytes < (1 << 20))
        buffers = 3 if use_triple else 2
        if use_triple:
            in_specs = [pl.BlockSpec((tb, C, W), lambda b: (b, 0, 0),
                                     pipeline_mode=pl.Buffered(3))]
            out_specs = pl.BlockSpec((tb, W, C), lambda b: (b, 0, 0),
                                     pipeline_mode=pl.Buffered(3))
        else:
            in_specs = [pl.BlockSpec((tb, C, W), lambda b: (b, 0, 0))]
            out_specs = pl.BlockSpec((tb, W, C), lambda b: (b, 0, 0))
        grid = (n_b,)
        dims = ("parallel",)
    else:
        # ---- Path B: tiled (C, W) blocks for large planes ----
        # 512 is a multiple of 128 (lane) and of 8/16/32 (sublane packing);
        # when a dim is smaller than the tile, use the full dim (full-extent
        # blocks are exempt from the (8,128) divisibility rule).
        tc = tile if C >= tile else C
        tw = tile if W >= tile else W
        n_w = pl.cdiv(W, tw)
        n_c = pl.cdiv(C, tc)
        block_bytes = 2 * tc * tw * itemsize
        buffers = 2
        # Keep n_c innermost: consecutive steps write adjacent lane-direction
        # chunks of the same output rows -> dense writeback DMAs.
        in_specs = [pl.BlockSpec((1, tc, tw), lambda b, w, c: (b, c, w))]
        out_specs = pl.BlockSpec((1, tw, tc), lambda b, w, c: (b, w, c))
        grid = (B, n_w, n_c)
        dims = ("parallel", "parallel", "parallel")

    vmem_limit = int(min(max(buffers * block_bytes + (4 << 20), 16 << 20),
                         32 << 20))

    return pl.pallas_call(
        _im2seq_kernel,
        out_shape=jax.ShapeDtypeStruct((B, W, C), x.dtype),
        grid=grid,
        in_specs=in_specs,
        out_specs=out_specs,
        compiler_params=pltpu.CompilerParams(
            dimension_semantics=dims,
            vmem_limit_bytes=vmem_limit,
        ),
    )(x3)


def _reference(x):
    B, C, H, W = x.shape
    return jnp.transpose(x.reshape(B, C, W), (0, 2, 1))


if __name__ == "__main__":
    key = jax.random.PRNGKey(0)
    k1, k2, k3 = jax.random.split(key, 3)

    # 1) Tiny shape (module's trivial case): Path A, full-plane batched block.
    B, C, H, W = 2, 4, 1, 16  # Im2Seq demands H == 1
    x_small = jax.random.normal(k1, (B, C, H, W), dtype=jnp.float32)
    out_small = jax.block_until_ready(im2seq(x_small))
    assert out_small.shape == (B, W, C), out_small.shape
    assert jnp.array_equal(out_small, _reference(x_small)), "small-shape mismatch"

    # 2) Real OCR-neck shape (C=512, W=80): Path A packs both batch planes
    #    into one ~320 KiB grid step with lane-dense (C=512) output stores.
    B2, C2, W2 = 2, 512, 80
    x_ocr = jax.random.normal(k2, (B2, C2, 1, W2), dtype=jnp.float32)
    out_ocr = jax.block_until_ready(im2seq(x_ocr))
    assert out_ocr.shape == (B2, W2, C2), out_ocr.shape
    assert jnp.array_equal(out_ocr, _reference(x_ocr)), "ocr-shape mismatch"

    # 3) Larger plane exercising Path B (512x512 tiles, W tail block masked).
    B3, C3, W3 = 2, 512, 640
    x_big = jax.random.normal(k3, (B3, C3, 1, W3), dtype=jnp.float32)
    out_big = jax.block_until_ready(im2seq(x_big))
    assert out_big.shape == (B3, W3, C3), out_big.shape
    assert jnp.array_equal(out_big, _reference(x_big)), "tiled-shape mismatch"

    print("KERNEL_OK")
</pallas_src>

<mosaic_0001>
module attributes {stable_mosaic.version = 11 : i64} {
  func.func @_im2seq_kernel(%arg0: i32, %arg1: memref<2x4x16xf32, #tpu.memory_space<vmem>>, %arg2: memref<2x16x4xf32, #tpu.memory_space<vmem>>) attributes {dimension_semantics = [#tpu.dimension_semantics<parallel>], iteration_bounds = array<i64: 1>, scalar_prefetch = 0 : i64, scratch_operands = 0 : i64, tpu.core_type = #tpu.core_type<tc>, window_params = [{transform_indices = @transform_0, window_bounds = array<i64: 2, 4, 16>}, {transform_indices = @transform_1, window_bounds = array<i64: 2, 16, 4>}]} {
    %c0 = arith.constant 0 : index
    %c0_0 = arith.constant 0 : index
    %c0_1 = arith.constant 0 : index
    %0 = vector.load %arg1[%c0, %c0_0, %c0_1] : memref<2x4x16xf32, #tpu.memory_space<vmem>>, vector<2x4x16xf32>
    %1 = tpu.transpose %0, [0, 2, 1] : vector<2x4x16xf32> -> vector<2x16x4xf32>
    %c0_2 = arith.constant 0 : index
    %c0_3 = arith.constant 0 : index
    %c0_4 = arith.constant 0 : index
    %2 = vector.load %arg2[%c0_2, %c0_3, %c0_4] : memref<2x16x4xf32, #tpu.memory_space<vmem>>, vector<2x16x4xf32>
    tpu.vector_store %arg2[%c0_2, %c0_3, %c0_4], %1 {strides = array<i32>} : memref<2x16x4xf32, #tpu.memory_space<vmem>>, vector<2x16x4xf32>,
    return
  }
  func.func @transform_0(%arg0: i32) -> (i32, i32, i32) {
    %c0_i32 = arith.constant 0 : i32
    %c0_i32_0 = arith.constant 0 : i32
    %c0_i32_1 = arith.constant 0 : i32
    return %arg0, %c0_i32, %c0_i32_0 : i32, i32, i32
  }
  func.func @transform_1(%arg0: i32) -> (i32, i32, i32) {
    %c0_i32 = arith.constant 0 : i32
    %c0_i32_0 = arith.constant 0 : i32
    %c0_i32_1 = arith.constant 0 : i32
    return %arg0, %c0_i32, %c0_i32_0 : i32, i32, i32
  }
}

</mosaic_0001>

<bundles_post_ra>
// kernel: tpu_custom_call.1
= control target key start
LH: loop header
LB: loop body
LE: loop exit
PB: predicated region body
PF: predicated region fallthrough
CT: control target
= control target key end

     0   :  { %6 = vsyncpa [#allocation3], 0  ;;  %s126_s6 = smov [#allocation2]   ;;  %s163_s0 = inlined_call_operand.hbm [shape: f32[2,4,16], index: 0, kind: input, shape index: {}]   ;;  %s164_s1 = inlined_call_operand.vmem [shape: f32[2,16,4], index: 1, kind: output, shape index: {}]  }
   0x1   :  { %s12_s7 = sshll.u32 %s126_s6, 4  ;;  %s102_s10 = scalar_lea.hbm %s163_s0, 128  ;;  %s13_s7 = int_to_ptr.vmem [resolvable:$true] %s12_s7 }
   0x2   :  { %p103_p0 = scmp.ne.s32.totalorder %s163_s0, %s102_s10  ;;  %p106_p1 = scmp.lt.u32.totalorder %s102_s10, %s163_s0 }
   0x4   :  { %p108_p2 = pnand %p106_p1, %p103_p0 }
   0x6   :  { %111 = shalt.err (!%p108_p2)
}
   0x7   :  { %s112_s15 = scalar_lea.vmem %s13_s7, 128  ;;  %p117_p4 = scmp.lt.s32.totalorder %s13_s7, %s13_s7 }
   0x8   :  { %p113_p3 = scmp.ne.s32.totalorder %s13_s7, %s112_s15  ;;  %p118_p5 = scmp.lt.s32.totalorder %s112_s15, %s112_s15 }
   0xa   :  { %p119_p6 = por %p118_p5, %p117_p4 }
   0xc   :  { %p120_p7 = pnand %p119_p6, %p113_p3 }
   0xe   :  { %123 = shalt.err (!%p120_p7)
}
   0xf   :  { %s127_s16 = smov 64   ;;  %s128_s17 = smov 4  }
  0x10   :  { %18 = dma.hbm_to_vmem [thread:$0]  %s163_s0, 128, %s13_s7, [#allocation3], %s127_s16, %s127_s16, %s128_s17  }
  0x11   :  { %124 = dma.done.wait [#allocation3], 128  }
  0x12   :  { %125 = vsyncadd [#allocation3], 4294967168  ;;  %v22_v0 = vld [vmem:[#allocation2] sm:$0xf]  ;;  %v23_v1 = vld [vmem:[#allocation2 + $0x4] sm:$0xf] }
  0x13   :  { %24 = vxpose.xlu0.b32.start.end [1/1] (short) (narrow) %v22_v0, 16  ;;  %vm88_vm0 = vcmask 31744  }
  0x18   :  { %56 = vxpose.xlu0.b32.start.end [1/1] (short) (narrow) %v23_v1, 16 }
  0x93   :  { %v40_v2 = vpop.trf.xlu0 }
  0x94   :  { %89 = vst.msk [vmem:[%s164_s1] sm:$0xff] %vm88_vm0, %v40_v2 }
  0x97   :  { %v41_v3 = vpop.trf.xlu0 }
  0x98   :  { %90 = vst.msk [vmem:[%s164_s1 + $0x8] sm:$0xff] %vm88_vm0, %v41_v3 }
  0x9b   :  { %v72_v4 = vpop.trf.xlu0 }
  0x9c   :  { %91 = vst.msk [vmem:[%s164_s1 + $0x10] sm:$0xff] %vm88_vm0, %v72_v4 }
  0x9f   :  { %v73_v5 = vpop.trf.xlu0 }
  0xa0   :  { %92 = vst.msk [vmem:[%s164_s1 + $0x18] sm:$0xff] %vm88_vm0, %v73_v5 }
  0xa1   :  { %97 = vsyncpa [#allocation3], 1 }

</bundles_post_ra>
